<compile_context>
chip_gen: v5e
topology: v5e:2x2
jax: 0.10.0
libtpu: 0.0.40
codegen_flags: <defaults>
</compile_context>

<pallas_src>
import functools

import jax
import jax.numpy as jnp
from jax.experimental import pallas as pl
from jax.experimental.pallas import tpu as pltpu


def _round_up(x, m):
    return ((x + m - 1) // m) * m


def _mpga_flash_kernel(qp_ref, kp_ref, vp1_ref, q_ref, m_ref, bias_ref,
                       o_ref, m_sc, acc_sc, *, c, has_pad):
    """One (batch, q-tile, kv-tile) grid step of the transposed flash MPGA.

    Layouts (query position is the lane axis everywhere that matters):
      qp_ref  : (1, C,  TQ) bf16  query projection, prune mask pre-folded
      kp_ref  : (1, TK, C)  bf16  key projection
      vp1_ref : (1, CR, TK) bf16  value projection; row `c` is all-ones (folds the
                                  softmax denominator into the MXU); rows > c are 0
      q_ref   : (1, C,  TQ) f32   original queries (final blend)
      m_ref   : (1, 1,  TQ) f32   prune mask per query position
      bias_ref: (TK, 1)     f32   0 for valid kv rows, -1e30 for padded kv rows
      o_ref   : (1, C,  TQ) f32
      m_sc    : (1, TQ)     f32   running row max
      acc_sc  : (CR, TQ)    f32   rows [0:c) un-normalized output, row c = denom
    """
    ki = pl.program_id(2)

    @pl.when(ki == 0)
    def _():
        m_sc[...] = jnp.full_like(m_sc, -jnp.inf)
        acc_sc[...] = jnp.zeros_like(acc_sc)

    # S^T tile: s[j, i] = sum_c Kp[j, c] * (m[i] * Qp[c, i])   (mask already folded)
    s = jnp.dot(kp_ref[0], qp_ref[0],
                preferred_element_type=jnp.float32)            # (TK, TQ) f32

    if has_pad:                       # static branch: only when N was padded
        s = s + bias_ref[...]         # (TK, 1) broadcast over query lanes

    # Online softmax update (stats live along the lane axis: shape (1, TQ)).
    m_prev = m_sc[...]
    m_new = jnp.maximum(m_prev, jnp.max(s, axis=0, keepdims=True))
    alpha = jnp.exp(m_prev - m_new)                            # (1, TQ)
    # exp kept f32 (portable across v5e); cast to bf16 only for the MXU.
    e = jnp.exp(s - m_new).astype(jnp.bfloat16)                # (TK, TQ)
    # PV matmul; the ones row of vp1 makes row `c` of the product the row-sum
    # of e, i.e. the softmax denominator -> no separate reduction needed.
    acc_sc[...] = alpha * acc_sc[...] + jnp.dot(
        vp1_ref[0], e, preferred_element_type=jnp.float32)     # (CR, TQ)
    m_sc[...] = m_new

    @pl.when(ki == pl.num_programs(2) - 1)
    def _():
        acc = acc_sc[...]
        inv_l = pl.reciprocal(acc[c:c + 1, :], approx=True)    # (1, TQ)
        o_att = acc[:c, :] * inv_l                             # (C, TQ)
        m_col = m_ref[0]                                       # (1, TQ)
        o_ref[0] = q_ref[0] * m_col + (1.0 - m_col) * o_att


def _nearest_interpolate(mask, out_w, out_h):
    """PyTorch-style F.interpolate(mode='nearest') to a target (out_w, out_h)."""
    _, _, in_w, in_h = mask.shape
    wi = (jnp.arange(out_w) * in_w) // out_w
    hi = (jnp.arange(out_h) * in_h) // out_h
    return mask[:, :, wi, :][:, :, :, hi]


def mpga_pallas(queries, keys, mask, Wq, bq, Wk, bk, Wv, bv):
    B, C, W, H = queries.shape
    N = W * H
    f32 = jnp.float32

    mask_full = _nearest_interpolate(mask, W, H).astype(f32)   # (B, 1, W, H)
    m_row = mask_full.reshape(B, 1, N)                         # (B, 1, N)

    qf = queries.reshape(B, C, N).astype(f32)                  # (B, C, N)
    kf = keys.reshape(B, C, N).astype(f32)                     # (B, C, N)

    Wq = Wq.astype(f32); Wk = Wk.astype(f32); Wv = Wv.astype(f32)

    # 1x1-conv projections hoisted to XLA, emitted directly in kernel layouts
    # (query/kv position is the last axis everywhere except the small K tile).
    qp = jnp.einsum('oc,bcn->bon', Wq, qf) + bq.astype(f32).reshape(1, C, 1)  # (B, C, N)
    kp = jnp.einsum('oc,bcn->bno', Wk, kf) + bk.astype(f32).reshape(1, 1, C)  # (B, N, C)
    vp = jnp.einsum('oc,bcn->bon', Wv, kf) + bv.astype(f32).reshape(1, C, 1)  # (B, C, N)

    # Fold the prune mask into Qp (before the bf16 cast): exact for 0/1 masks,
    # removes one full (TQ,TK) VPU multiply per inner grid step.
    qp = qp * m_row

    n_pad = _round_up(N, 128)
    has_pad = n_pad != N

    # kv tile: moderate, bounds the (TK, TQ) f32 intermediates.
    blk_k = 128
    for cand in (512, 256, 128):
        if n_pad % cand == 0:
            blk_k = cand
            break

    # q tile: as large as a conservative VMEM budget allows (fewer grid steps,
    # less K/V re-streaming), while keeping >= 2 parallel units for the v7x
    # megacore whenever possible.
    c_rows = _round_up(C + 1, 8)   # Vp rows + ones row, padded to sublane mult.

    def vmem_bytes(bq_, bk_):
        temps = 3 * bq_ * bk_ * 4                                  # s / s-m / e (f32)
        io = 2 * (C * bq_ * 2 + bk_ * C * 2 + c_rows * bk_ * 2     # bf16 tiles (x2 buf)
                  + C * bq_ * 4 + bq_ * 4 + bk_ * 4 + C * bq_ * 4)  # f32 q/m/bias/out
        scratch = (c_rows + 1) * bq_ * 4
        return temps + io + scratch

    budget = 20 * 1024 * 1024   # under the 32 MiB scoped limit on all generations
    blk_q = 128
    for cand in (2048, 1024, 512, 256, 128):
        if n_pad % cand != 0:
            continue
        if cand > 128 and B * (n_pad // cand) < 2:
            continue            # keep both v7x TensorCores fed
        if vmem_bytes(cand, blk_k) <= budget:
            blk_q = cand
            break

    def pad_n(x, axis):
        extra = n_pad - N
        if extra == 0:
            return x
        cfg = [(0, 0)] * x.ndim
        cfg[axis] = (0, extra)
        return jnp.pad(x, cfg)

    qp_b = pad_n(qp, 2).astype(jnp.bfloat16)                   # (B, C,  Np) bf16
    kp_b = pad_n(kp, 1).astype(jnp.bfloat16)                   # (B, Np, C)  bf16
    vp_p = pad_n(vp, 2)                                        # (B, C,  Np) f32
    ones = jnp.ones((B, 1, n_pad), f32)
    zeros = jnp.zeros((B, c_rows - C - 1, n_pad), f32)
    vp1_b = jnp.concatenate([vp_p, ones, zeros], axis=1).astype(jnp.bfloat16)  # (B, CR, Np)
    q_p = pad_n(qf, 2)                                         # (B, C, Np) f32
    m_p = pad_n(m_row, 2)                                      # (B, 1, Np) f32
    # Additive kv-padding bias (0 for valid columns, -1e30 for padded ones).
    bias = jnp.where(jnp.arange(n_pad) < N, 0.0, -1e30).astype(f32).reshape(n_pad, 1)

    grid = (B, n_pad // blk_q, n_pad // blk_k)

    kernel = functools.partial(_mpga_flash_kernel, c=C, has_pad=has_pad)

    out = pl.pallas_call(
        kernel,
        out_shape=jax.ShapeDtypeStruct((B, C, n_pad), f32),
        grid=grid,
        in_specs=[
            pl.BlockSpec((1, C, blk_q), lambda b, qi, ki: (b, 0, qi)),       # Qp (masked)
            pl.BlockSpec((1, blk_k, C), lambda b, qi, ki: (b, ki, 0)),       # Kp
            pl.BlockSpec((1, c_rows, blk_k), lambda b, qi, ki: (b, 0, ki)),  # Vp + ones
            pl.BlockSpec((1, C, blk_q), lambda b, qi, ki: (b, 0, qi)),       # queries
            pl.BlockSpec((1, 1, blk_q), lambda b, qi, ki: (b, 0, qi)),       # mask
            pl.BlockSpec((blk_k, 1), lambda b, qi, ki: (ki, 0)),             # pad bias
        ],
        out_specs=pl.BlockSpec((1, C, blk_q), lambda b, qi, ki: (b, 0, qi)),
        scratch_shapes=[
            pltpu.VMEM((1, blk_q), jnp.float32),        # running max
            pltpu.VMEM((c_rows, blk_q), jnp.float32),   # acc rows + denominator row
        ],
        compiler_params=pltpu.CompilerParams(
            dimension_semantics=("parallel", "parallel", "arbitrary"),
            vmem_limit_bytes=32 * 1024 * 1024),
    )(qp_b, kp_b, vp1_b, q_p, m_p, bias)

    return out[:, :, :N].reshape(B, C, W, H)                   # already (B, C, ...)


def mpga_reference(queries, keys, mask, Wq, bq, Wk, bk, Wv, bv):
    """Pure-JAX f32 reference mirroring the PyTorch forward."""
    B, C, W, H = queries.shape
    N = W * H
    mask_full = _nearest_interpolate(mask, W, H).astype(jnp.float32)
    qf = queries.reshape(B, C, N)
    kf = keys.reshape(B, C, N)
    m = mask_full.reshape(B, 1, N)

    Qp = jnp.einsum('oc,bcn->bon', Wq, qf) + bq.reshape(1, C, 1)
    Kp = jnp.einsum('oc,bcn->bon', Wk, kf) + bk.reshape(1, C, 1)
    Vp = jnp.einsum('oc,bcn->bon', Wv, kf) + bv.reshape(1, C, 1)

    S = jnp.einsum('bci,bcj->bij', Qp, Kp)
    P = S * jnp.swapaxes(m, 1, 2)                 # row i scaled by m[i]
    A = jax.nn.softmax(P, axis=-1)
    O = jnp.einsum('bcj,bij->bci', Vp, A)
    out = qf * m + (1.0 - m) * O
    return out.reshape(B, C, W, H)


if __name__ == "__main__":
    B, C, W, H = 2, 4, 16, 16
    Wi, Hi = 8, 8   # initial mask resolution (nearest-upsampled to W, H)

    key = jax.random.PRNGKey(0)
    kq, kk, km, k1, k2, k3, k4, k5, k6 = jax.random.split(key, 9)

    queries = jax.random.normal(kq, (B, C, W, H), jnp.float32)
    keys = jax.random.normal(kk, (B, C, W, H), jnp.float32)
    mask = (jax.random.uniform(km, (B, 1, Wi, Hi)) > 0.5).astype(jnp.float32)

    # Conv2d(C, C, 1) parameters: weight (C, C), bias (C,)
    Wq = 0.2 * jax.random.normal(k1, (C, C), jnp.float32)
    bq = 0.1 * jax.random.normal(k2, (C,), jnp.float32)
    Wk = 0.2 * jax.random.normal(k3, (C, C), jnp.float32)
    bk = 0.1 * jax.random.normal(k4, (C,), jnp.float32)
    Wv = 0.2 * jax.random.normal(k5, (C, C), jnp.float32)
    bv = 0.1 * jax.random.normal(k6, (C,), jnp.float32)

    out = mpga_pallas(queries, keys, mask, Wq, bq, Wk, bk, Wv, bv)
    jax.block_until_ready(out)

    ref = mpga_reference(queries, keys, mask, Wq, bq, Wk, bk, Wv, bv)
    assert out.shape == (B, C, W, H)
    # bf16 MXU operands (with f32 accumulation) + approx reciprocal -> bf16 tolerance.
    assert jnp.allclose(out, ref, rtol=2e-2, atol=2e-2), (
        f"max abs err = {jnp.max(jnp.abs(out - ref))}")

    print("KERNEL_OK")
</pallas_src>

<mosaic_0001>
module attributes {stable_mosaic.version = 11 : i64} {
  func.func @_mpga_flash_kernel(%arg0: i32, %arg1: i32, %arg2: i32, %arg3: memref<1x4x256xbf16, #tpu.memory_space<vmem>>, %arg4: memref<1x256x4xbf16, #tpu.memory_space<vmem>>, %arg5: memref<1x8x256xbf16, #tpu.memory_space<vmem>>, %arg6: memref<1x4x256xf32, #tpu.memory_space<vmem>>, %arg7: memref<1x1x256xf32, #tpu.memory_space<vmem>>, %arg8: memref<256x1xf32, #tpu.memory_space<vmem>>, %arg9: memref<1x4x256xf32, #tpu.memory_space<vmem>>, %arg10: memref<1x256xf32, #tpu.memory_space<vmem>>, %arg11: memref<8x256xf32, #tpu.memory_space<vmem>>) attributes {dimension_semantics = [#tpu.dimension_semantics<parallel>, #tpu.dimension_semantics<parallel>, #tpu.dimension_semantics<arbitrary>], iteration_bounds = array<i64: 2, 1, 1>, scalar_prefetch = 0 : i64, scratch_operands = 2 : i64, tpu.core_type = #tpu.core_type<tc>, window_params = [{transform_indices = @transform_0, window_bounds = array<i64: 1, 4, 256>}, {transform_indices = @transform_1, window_bounds = array<i64: 1, 256, 4>}, {transform_indices = @transform_2, window_bounds = array<i64: 1, 8, 256>}, {transform_indices = @transform_3, window_bounds = array<i64: 1, 4, 256>}, {transform_indices = @transform_4, window_bounds = array<i64: 1, 1, 256>}, {transform_indices = @transform_5, window_bounds = array<i64: 256, 1>}, {transform_indices = @transform_6, window_bounds = array<i64: 1, 4, 256>}]} {
    %c0_i32 = arith.constant 0 : i32
    %0 = arith.cmpi eq, %arg2, %c0_i32 : i32
    %1 = arith.extui %0 : i1 to i32
    %c0_i32_0 = arith.constant 0 : i32
    %2 = arith.cmpi ne, %1, %c0_i32_0 : i32
    scf.if %2 {
      %cst_21 = arith.constant 0xFF800000 : f32
      %30 = vector.broadcast %cst_21 : f32 to vector<1x256xf32>
      %c0_22 = arith.constant 0 : index
      %c0_23 = arith.constant 0 : index
      %31 = vector.load %arg10[%c0_22, %c0_23] : memref<1x256xf32, #tpu.memory_space<vmem>>, vector<1x256xf32>
      tpu.vector_store %arg10[%c0_22, %c0_23], %30 {strides = array<i32>} : memref<1x256xf32, #tpu.memory_space<vmem>>, vector<1x256xf32>,
      %cst_24 = arith.constant 0.000000e+00 : f32
      %32 = vector.broadcast %cst_24 : f32 to vector<8x256xf32>
      %c0_25 = arith.constant 0 : index
      %c0_26 = arith.constant 0 : index
      %33 = vector.load %arg11[%c0_25, %c0_26] : memref<8x256xf32, #tpu.memory_space<vmem>>, vector<8x256xf32>
      tpu.vector_store %arg11[%c0_25, %c0_26], %32 {strides = array<i32>} : memref<8x256xf32, #tpu.memory_space<vmem>>, vector<8x256xf32>,
    } else {
    }
    %c0 = arith.constant 0 : index
    %c0_1 = arith.constant 0 : index
    %c0_2 = arith.constant 0 : index
    %3 = vector.load %arg4[%c0, %c0_1, %c0_2] : memref<1x256x4xbf16, #tpu.memory_space<vmem>>, vector<1x256x4xbf16>
    %4 = vector.shape_cast %3 : vector<1x256x4xbf16> to vector<256x4xbf16>
    %c0_3 = arith.constant 0 : index
    %c0_4 = arith.constant 0 : index
    %c0_5 = arith.constant 0 : index
    %5 = vector.load %arg3[%c0_3, %c0_4, %c0_5] : memref<1x4x256xbf16, #tpu.memory_space<vmem>>, vector<1x4x256xbf16>
    %6 = vector.shape_cast %5 : vector<1x4x256xbf16> to vector<4x256xbf16>
    %cst = arith.constant dense<0.000000e+00> : vector<256x256xf32>
    %7 = tpu.matmul %4, %6, %cst {dimension_numbers = #tpu.dot_dimension_numbers<[1], [0], [0], [1], [0, 0, 1, 1], [], []>} : vector<256x4xbf16>, vector<4x256xbf16>, vector<256x256xf32> -> vector<256x256xf32>
    %c0_6 = arith.constant 0 : index
    %c0_7 = arith.constant 0 : index
    %8 = vector.load %arg10[%c0_6, %c0_7] : memref<1x256xf32, #tpu.memory_space<vmem>>, vector<1x256xf32>
    %cst_8 = arith.constant dense<0xFF800000> : vector<256xf32>
    %9 = vector.multi_reduction <maximumf>, %7, %cst_8 [0] : vector<256x256xf32> to vector<256xf32>
    %10 = vector.shape_cast %9 : vector<256xf32> to vector<1x256xf32>
    %11 = arith.maximumf %8, %10 : vector<1x256xf32>
    %12 = arith.subf %8, %11 : vector<1x256xf32>
    %13 = math.exp %12 : vector<1x256xf32>
    %14 = vector.broadcast %11 : vector<1x256xf32> to vector<256x256xf32>
    %15 = arith.subf %7, %14 : vector<256x256xf32>
    %16 = math.exp %15 : vector<256x256xf32>
    %17 = arith.truncf %16 : vector<256x256xf32> to vector<256x256xbf16>
    %c0_9 = arith.constant 0 : index
    %c0_10 = arith.constant 0 : index
    %18 = vector.load %arg11[%c0_9, %c0_10] : memref<8x256xf32, #tpu.memory_space<vmem>>, vector<8x256xf32>
    %19 = vector.broadcast %13 : vector<1x256xf32> to vector<8x256xf32>
    %20 = arith.mulf %19, %18 : vector<8x256xf32>
    %c0_11 = arith.constant 0 : index
    %c0_12 = arith.constant 0 : index
    %c0_13 = arith.constant 0 : index
    %21 = vector.load %arg5[%c0_11, %c0_12, %c0_13] : memref<1x8x256xbf16, #tpu.memory_space<vmem>>, vector<1x8x256xbf16>
    %22 = vector.shape_cast %21 : vector<1x8x256xbf16> to vector<8x256xbf16>
    %cst_14 = arith.constant dense<0.000000e+00> : vector<8x256xf32>
    %23 = tpu.matmul %22, %17, %cst_14 {dimension_numbers = #tpu.dot_dimension_numbers<[1], [0], [0], [1], [0, 0, 1, 1], [], []>} : vector<8x256xbf16>, vector<256x256xbf16>, vector<8x256xf32> -> vector<8x256xf32>
    %24 = arith.addf %20, %23 : vector<8x256xf32>
    %c0_15 = arith.constant 0 : index
    %c0_16 = arith.constant 0 : index
    %25 = vector.load %arg11[%c0_15, %c0_16] : memref<8x256xf32, #tpu.memory_space<vmem>>, vector<8x256xf32>
    tpu.vector_store %arg11[%c0_15, %c0_16], %24 {strides = array<i32>} : memref<8x256xf32, #tpu.memory_space<vmem>>, vector<8x256xf32>,
    %c0_17 = arith.constant 0 : index
    %c0_18 = arith.constant 0 : index
    %26 = vector.load %arg10[%c0_17, %c0_18] : memref<1x256xf32, #tpu.memory_space<vmem>>, vector<1x256xf32>
    tpu.vector_store %arg10[%c0_17, %c0_18], %11 {strides = array<i32>} : memref<1x256xf32, #tpu.memory_space<vmem>>, vector<1x256xf32>,
    %c0_i32_19 = arith.constant 0 : i32
    %27 = arith.cmpi eq, %arg2, %c0_i32_19 : i32
    %28 = arith.extui %27 : i1 to i32
    %c0_i32_20 = arith.constant 0 : i32
    %29 = arith.cmpi ne, %28, %c0_i32_20 : i32
    scf.if %29 {
      %c0_21 = arith.constant 0 : index
      %c0_22 = arith.constant 0 : index
      %30 = vector.load %arg11[%c0_21, %c0_22] : memref<8x256xf32, #tpu.memory_space<vmem>>, vector<8x256xf32>
      %31 = vector.extract_strided_slice %30 {offsets = [4, 0], sizes = [1, 256], strides = [1, 1]} : vector<8x256xf32> to vector<1x256xf32>
      %32 = tpu.reciprocal %31 {approx = true} : vector<1x256xf32> -> vector<1x256xf32>
      %33 = vector.extract_strided_slice %30 {offsets = [0, 0], sizes = [4, 256], strides = [1, 1]} : vector<8x256xf32> to vector<4x256xf32>
      %34 = vector.broadcast %32 : vector<1x256xf32> to vector<4x256xf32>
      %35 = arith.mulf %33, %34 : vector<4x256xf32>
      %c0_23 = arith.constant 0 : index
      %c0_24 = arith.constant 0 : index
      %c0_25 = arith.constant 0 : index
      %36 = vector.load %arg7[%c0_23, %c0_24, %c0_25] : memref<1x1x256xf32, #tpu.memory_space<vmem>>, vector<1x1x256xf32>
      %37 = vector.shape_cast %36 : vector<1x1x256xf32> to vector<1x256xf32>
      %c0_26 = arith.constant 0 : index
      %c0_27 = arith.constant 0 : index
      %c0_28 = arith.constant 0 : index
      %38 = vector.load %arg6[%c0_26, %c0_27, %c0_28] : memref<1x4x256xf32, #tpu.memory_space<vmem>>, vector<1x4x256xf32>
      %39 = vector.shape_cast %38 : vector<1x4x256xf32> to vector<4x256xf32>
      %40 = vector.broadcast %37 : vector<1x256xf32> to vector<4x256xf32>
      %41 = arith.mulf %39, %40 : vector<4x256xf32>
      %cst_29 = arith.constant 1.000000e+00 : f32
      %42 = vector.broadcast %cst_29 : f32 to vector<1x256xf32>
      %43 = arith.subf %42, %37 : vector<1x256xf32>
      %44 = vector.broadcast %43 : vector<1x256xf32> to vector<4x256xf32>
      %45 = arith.mulf %44, %35 : vector<4x256xf32>
      %46 = arith.addf %41, %45 : vector<4x256xf32>
      %c0_30 = arith.constant 0 : index
      %c0_31 = arith.constant 0 : index
      %c0_32 = arith.constant 0 : index
      %47 = vector.load %arg9[%c0_30, %c0_31, %c0_32] : memref<1x4x256xf32, #tpu.memory_space<vmem>>, vector<1x4x256xf32>
      %48 = vector.shape_cast %47 : vector<1x4x256xf32> to vector<4x256xf32>
      %49 = vector.shape_cast %46 : vector<4x256xf32> to vector<1x4x256xf32>
      tpu.vector_store %arg9[%c0_30, %c0_31, %c0_32], %49 {strides = array<i32>} : memref<1x4x256xf32, #tpu.memory_space<vmem>>, vector<1x4x256xf32>,
    } else {
    }
    return
  }
  func.func @transform_0(%arg0: i32, %arg1: i32, %arg2: i32) -> (i32, i32, i32) {
    %c0_i32 = arith.constant 0 : i32
    %c0_i32_0 = arith.constant 0 : i32
    return %arg0, %c0_i32, %arg1 : i32, i32, i32
  }
  func.func @transform_1(%arg0: i32, %arg1: i32, %arg2: i32) -> (i32, i32, i32) {
    %c0_i32 = arith.constant 0 : i32
    %c0_i32_0 = arith.constant 0 : i32
    return %arg0, %arg2, %c0_i32 : i32, i32, i32
  }
  func.func @transform_2(%arg0: i32, %arg1: i32, %arg2: i32) -> (i32, i32, i32) {
    %c0_i32 = arith.constant 0 : i32
    %c0_i32_0 = arith.constant 0 : i32
    return %arg0, %c0_i32, %arg2 : i32, i32, i32
  }
  func.func @transform_3(%arg0: i32, %arg1: i32, %arg2: i32) -> (i32, i32, i32) {
    %c0_i32 = arith.constant 0 : i32
    %c0_i32_0 = arith.constant 0 : i32
    return %arg0, %c0_i32, %arg1 : i32, i32, i32
  }
  func.func @transform_4(%arg0: i32, %arg1: i32, %arg2: i32) -> (i32, i32, i32) {
    %c0_i32 = arith.constant 0 : i32
    %c0_i32_0 = arith.constant 0 : i32
    return %arg0, %c0_i32, %arg1 : i32, i32, i32
  }
  func.func @transform_5(%arg0: i32, %arg1: i32, %arg2: i32) -> (i32, i32) {
    %c0_i32 = arith.constant 0 : i32
    %c0_i32_0 = arith.constant 0 : i32
    return %arg2, %c0_i32 : i32, i32
  }
  func.func @transform_6(%arg0: i32, %arg1: i32, %arg2: i32) -> (i32, i32, i32) {
    %c0_i32 = arith.constant 0 : i32
    %c0_i32_0 = arith.constant 0 : i32
    return %arg0, %c0_i32, %arg1 : i32, i32, i32
  }
}

</mosaic_0001>

<bundles_post_ra>
// kernel: tpu_custom_call.1
= control target key start
LH: loop header
LB: loop body
LE: loop exit
PB: predicated region body
PF: predicated region fallthrough
CT: control target
= control target key end

     0   :  { %11 = vsyncpa [#allocation5], 0  ;;  %s2426_s0 = inlined_call_operand.vmem [shape: bf16[2,4,256], index: 0, kind: input, shape index: {}]   ;;  %s2427_s1 = inlined_call_operand.vmem [shape: bf16[2,256,4], index: 1, kind: input, shape index: {}]   ;;  %s2428_s2 = inlined_call_operand.vmem [shape: bf16[2,8,256], index: 2, kind: input, shape index: {}]   ;;  %s2429_s3 = inlined_call_operand.vmem [shape: f32[2,4,256], index: 3, kind: input, shape index: {}]   ;;  %s2430_s4 = inlined_call_operand.vmem [shape: f32[2,1,256], index: 4, kind: input, shape index: {}]   ;;  %s2431_s5 = inlined_call_operand.vmem [shape: f32[256,1], index: 5, kind: input, shape index: {}]   ;;  %s2432_s6 = inlined_call_operand.hbm [shape: f32[2,4,256], index: 6, kind: output, shape index: {}]  }
   0x1   :  { %13 = vsyncpa [#allocation5 + $0x1], 0  ;;  %s1868_s21 = smov 0   ;;  %s1870_s22 = smov 0  }
   0x2   :  { %s1872_s23 = smov 0   ;;  %s1874_s24 = smov 0  }
   0x3   :  { %s1876_s25 = smov 0   ;;  %s1878_s26 = smov 0  }
   0x4 LB: > { %s1422_s5 = sadd.s32 4294967295, %s1830_s26   ;;  %s1423_s27 = sadd.s32 4294967294, %s1830_s26   ;;  %s1830_s26 = sphi %s1878_s26, %s19_s26   ;;  %s1826_s25 = sphi %s1876_s25, %s2510_s25   ;;  %s1822_s24 = sphi %s1874_s24, %s2509_s24   ;;  %s1818_s23 = sphi %s1872_s23, %s2508_s23   ;;  %s1814_s22 = sphi %s1870_s22, %s2507_s22   ;;  %s1810_s21 = sphi %s1868_s21, %s2506_s21  }
   0x5   : > { %s38_s28 = sadd.s32 1, %s1826_s25  ;;  %s213_s29 = sadd.s32 1, %s1818_s23 }
   0x6   : > { %p40_p0 = scmp.ge.s32.totalorder %s38_s28, 2  ;;  %p223_p1 = scmp.ne.s32.totalorder %s1818_s23, %s1814_s22 }
   0x7   : > { %p224_p2 = scmp.eq.s32.totalorder %s1422_s5, 1  ;;  %p229_p3 = scmp.ne.s32.totalorder %s1814_s22, %s1810_s21 }
   0x8   : > { %s2512_s28 = smov (%p40_p0, %s38_s28), 0  ;;  %p230_p5 = scmp.eq.s32.totalorder %s1423_s27, 1 }
   0x9   : > { %p1908_p4 = por %p224_p2, %p223_p1  ;;  %s208_s7 = ssub.s32 %s1826_s25, %s2512_s28 }
   0xa   : > { %p1427_p6 = scmp.ge.s32.totalorder %s1830_s26, 1  ;;  %p211_p7 = scmp.eq.s32.totalorder %s208_s7, 0 }
   0xb   : > { %p1915_p8 = por %p230_p5, %p229_p3  ;;  %p321_p9 = scmp.lt.s32.totalorder %s1830_s26, 3 }
   0xc   : > { %s1921_s9 = scalar_select %p211_p7, %s1818_s23, %s213_s29  }
   0xd   : > { %p322_p10 = pnand %p1427_p6, %p321_p9 }
   0xf   : > { %325 = sbr.rel (%p322_p10) target bundleno = 612 (0x264), region = 44 }
  0x14   : > { %p396_p11 = scmp.lt.s32.totalorder %s1822_s24, 1  ;;  %vm629_vm0 = vcmask 1041408   ;;  %vm580_vm1 = vcmask 31744   ;;  %vm890_vm3 = vcmask 1040384   ;;  %s392_s13 = sand.u32 1, %s1814_s22   ;;  %vm1221_vm4 = vcmask 1043456  }
  0x15   : > { %s1428_s17 = sshll.u32 %s392_s13, 3 }
  0x16   : > { %s1925_s10 = scalar_select %p396_p11, %s1822_s24, 1 }
  0x18   : > { %s1539_s11 = sshll.u32 %s1925_s10, 2  ;;  %s1540_s15 = sshll.u32 %s1925_s10, 7 }
  0x19   : > { %s403_s14 = scalar_lea.vmem %s2426_s0, %s1539_s11  ;;  %s1935_s18 = scalar_lea.vmem %s2427_s1, %s1540_s15 }
  0x1a   : > { %v495_v0 = vld [vmem:[%s403_s14] sm:$0xf]  ;;  %v1544_v6 = vld [vmem:[%s1935_s18 + $0x8] sm:$0xff]  ;;  %v1553_v7 = vld [vmem:[%s1935_s18 + $0x50] sm:$0xff]  ;;  %s1541_s19 = sshll.u32 %s1925_s10, 3  ;;  %s1437_s29 = sshll.u32 %s1925_s10, 1 }
  0x1b   : > { %577 = vst [vmem:[#allocation1] ss:$4 sm:$0xff] %v495_v0  ;;  %v1543_v5 = vld [vmem:[%s1935_s18] sm:$0xff]  ;;  %v1545_v8 = vld [vmem:[%s1935_s18 + $0x10] sm:$0xff]  ;;  %v1554_v9 = vld [vmem:[%s1935_s18 + $0x58] sm:$0xff]  ;;  %s423_s27 = scalar_lea.vmem %s2428_s2, %s1541_s19  ;;  %s442_s12 = scalar_lea.vmem %s2430_s4, %s1437_s29 }
  0x1c   : > { %v1546_v10 = vld [vmem:[%s1935_s18 + $0x18] sm:$0xff]  ;;  %v1555_v11 = vld [vmem:[%s1935_s18 + $0x60] sm:$0xff]  ;;  %v1556_v13 = vld [vmem:[%s1935_s18 + $0x68] sm:$0xff]  ;;  %s433_s16 = scalar_lea.vmem %s2429_s3, %s1541_s19  ;;  %s394_s19 = scalar_lea.vmem [#allocation4], %s1428_s17 }
  0x1d   : > { %v1547_v12 = vld [vmem:[%s1935_s18 + $0x20] sm:$0xff]  ;;  %v1548_v14 = vld [vmem:[%s1935_s18 + $0x28] sm:$0xff]  ;;  %v1549_v15 = vld [vmem:[%s1935_s18 + $0x30] sm:$0xff]  ;;  %s1772_s15 = scalar_lea.hbm %s2432_s6, 16 }
  0x1e   : > { %v1557_v16 = vld [vmem:[%s1935_s18 + $0x70] sm:$0xff]  ;;  %v1550_v17 = vld [vmem:[%s1935_s18 + $0x38] sm:$0xff]  ;;  %v1551_v19 = vld [vmem:[%s1935_s18 + $0x40] sm:$0xff] }
  0x1f   : > { %v1558_v18 = vld [vmem:[%s1935_s18 + $0x78] sm:$0xff]  ;;  %v1552_v24 = vld [vmem:[%s1935_s18 + $0x48] sm:$0xff]  ;;  %s1559_s18 = sshll.u32 %s1822_s24, 3  ;;  %s1241_s24 = scalar_lea.sflag [#allocation5], %s392_s13 }
  0x20   : > { %s1254_s10 = scalar_lea.hbm %s2432_s6, %s1559_s18 }
  0x21   : > { %s1258_s29 = sshll.u32 %s1254_s10, 4  ;;  %s1259_s29 = int_to_ptr.hbm [resolvable:$true] %s1258_s29 }
  0x22   : > { %v578_v1 = vld.sshfl [vmem:[#allocation1] sm:$0xff pattern:$0x73625140]  ;;  %v579_v2 = vld.sshfl [vmem:[#allocation1 + $0x8] sm:$0xff pattern:$0x73625140] }
  0x23   : > { %v630_v3 = vsel %vm629_vm0, %v578_v1, 0  ;;  %v632_v4 = vsel %vm629_vm0, %v579_v2, 0  ;;  %s1766_s7 = sshra.s32 %s1259_s29, 4  ;;  %s1767_s7 = int_to_ptr.hbm [resolvable:$true] %s1766_s7 }
  0x24   : > { %641 = vmatpush.bf16.msra.mxu0 %v630_v3  ;;  %730 = vmatpush.bf16.msra.mxu1 %v632_v4  ;;  %s1768_s11 = scalar_lea.hbm %s1767_s7, 8  ;;  %p1773_p1 = scmp.lt.s32.totalorder %s1767_s7, %s2432_s6 }
  0x25   : > { %1561 = vmatpush.bf16.msra.mxu3 %v632_v4  ;;  %1560 = vmatpush.bf16.msra.mxu2 %v630_v3  ;;  %p1769_p12 = scmp.ne.s32.totalorder %s1767_s7, %s1768_s11  ;;  %p1774_p2 = scmp.lt.s32.totalorder %s1772_s15, %s1768_s11 }
  0x27   : > { %1502 = vmatmul.msk.bf16.vlgmr.msra.gmra.mxu0 %vm580_vm1, %v1543_v5  ;;  %1518 = vmatmul.msk.bf16.vlgmr.msra.gmra.mxu1 %vm580_vm1, %v1543_v5  ;;  %p1770_p13 = pnand %p1769_p12, %p1908_p4  ;;  %p1775_p3 = por %p1774_p2, %p1773_p1 }
  0x28   : > { %1528 = vmatmul.msk.bf16.vlgmr.msra.gmra.mxu3 %vm580_vm1, %v1553_v7  ;;  %1512 = vmatmul.msk.bf16.vlgmr.msra.gmra.mxu2 %vm580_vm1, %v1553_v7 }
  0x29   : > { %p1771_p0 = pneg %p1770_p13 }
  0x2b   : > { %p1776_p5 = pnand %p1775_p3, %p1771_p0 }
  0x37   : > { %1503 = vmatmul.msk.bf16.gmra.mxu0 %vm580_vm1, %v1544_v6  ;;  %1519 = vmatmul.msk.bf16.gmra.mxu1 %vm580_vm1, %v1544_v6 }
  0x38   : > { %1529 = vmatmul.msk.bf16.gmra.mxu3 %vm580_vm1, %v1554_v9  ;;  %1513 = vmatmul.msk.bf16.gmra.mxu2 %vm580_vm1, %v1554_v9 }
  0x47   : > { %1504 = vmatmul.msk.bf16.gmra.mxu0 %vm580_vm1, %v1545_v8  ;;  %1520 = vmatmul.msk.bf16.gmra.mxu1 %vm580_vm1, %v1545_v8 }
  0x48   : > { %1530 = vmatmul.msk.bf16.gmra.mxu3 %vm580_vm1, %v1555_v11  ;;  %1514 = vmatmul.msk.bf16.gmra.mxu2 %vm580_vm1, %v1555_v11 }
  0x57   : > { %1505 = vmatmul.msk.bf16.gmra.mxu0 %vm580_vm1, %v1546_v10  ;;  %1521 = vmatmul.msk.bf16.gmra.mxu1 %vm580_vm1, %v1546_v10 }
  0x58   : > { %1531 = vmatmul.msk.bf16.gmra.mxu3 %vm580_vm1, %v1556_v13  ;;  %1515 = vmatmul.msk.bf16.gmra.mxu2 %vm580_vm1, %v1556_v13 }
  0x67   : > { %1506 = vmatmul.msk.bf16.gmra.mxu0 %vm580_vm1, %v1547_v12  ;;  %1522 = vmatmul.msk.bf16.gmra.mxu1 %vm580_vm1, %v1547_v12 }
  0x68   : > { %1532 = vmatmul.msk.bf16.gmra.mxu3 %vm580_vm1, %v1557_v16  ;;  %1516 = vmatmul.msk.bf16.gmra.mxu2 %vm580_vm1, %v1557_v16 }
  0x77   : > { %1507 = vmatmul.msk.bf16.gmra.mxu0 %vm580_vm1, %v1548_v14  ;;  %1523 = vmatmul.msk.bf16.gmra.mxu1 %vm580_vm1, %v1548_v14 }
  0x78   : > { %1533 = vmatmul.msk.bf16.gmra.mxu3 %vm580_vm1, %v1558_v18  ;;  %1517 = vmatmul.msk.bf16.gmra.mxu2 %vm580_vm1, %v1558_v18 }
  0x87   : > { %1508 = vmatmul.msk.bf16.gmra.mxu0 %vm580_vm1, %v1549_v15  ;;  %1524 = vmatmul.msk.bf16.gmra.mxu1 %vm580_vm1, %v1549_v15 }
  0x97   : > { %1509 = vmatmul.msk.bf16.gmra.mxu0 %vm580_vm1, %v1550_v17  ;;  %1525 = vmatmul.msk.bf16.gmra.mxu1 %vm580_vm1, %v1550_v17 }
  0xa4   : > { %v1980_v20 = vpop.f32.mrf.mxu0  ;;  %v1982_v21 = vpop.f32.mrf.mxu1 }
  0xa5   : > { %2458 = vst [vmem:[#allocation7_spill] sm:$0xff] %v1982_v21 }
  0xa7   : > { %1510 = vmatmul.msk.bf16.gmra.mxu0 %vm580_vm1, %v1551_v19  ;;  %1526 = vmatmul.msk.bf16.gmra.mxu1 %vm580_vm1, %v1551_v19 }
  0xab   : > { %v2013_v35 = vpop.f32.mrf.mxu3  ;;  %v2015_v36 = vpop.f32.mrf.mxu2 }
  0xac   : > { %v1986_v22 = vpop.f32.mrf.mxu0  ;;  %v1988_v23 = vpop.f32.mrf.mxu1  ;;  %2465 = vst [vmem:[#allocation14_spill] sm:$0xff] %v2013_v35 }
  0xad   : > { %2459 = vst [vmem:[#allocation8_spill] sm:$0xff] %v1988_v23 }
  0xb3   : > { %v2021_v39 = vpop.f32.mrf.mxu3  ;;  %v2023_v40 = vpop.f32.mrf.mxu2 }
  0xb4   : > { %v1991_v25 = vpop.f32.mrf.mxu0  ;;  %v1993_v26 = vpop.f32.mrf.mxu1  ;;  %2467 = vst [vmem:[#allocation16_spill] sm:$0xff] %v2021_v39 }
  0xb5   : > { %2460 = vst [vmem:[#allocation9_spill] sm:$0xff] %v1993_v26  ;;  %v813_v7 = vmax.f32 %v1980_v20, %v1991_v25  ;;  %v850_v8 = vmax.f32 %v1982_v21, %v1993_v26 }
  0xb6   : > { %2468 = vst [vmem:[#allocation17_spill] sm:$0xff] %v2023_v40 }
  0xb7   : > { %1511 = vmatmul.msk.bf16.gmra.mxu0 %vm580_vm1, %v1552_v24  ;;  %1527 = vmatmul.msk.bf16.gmra.mxu1 %vm580_vm1, %v1552_v24 }
  0xbb   : > { %v2033_v45 = vpop.f32.mrf.mxu3  ;;  %v2035_v46 = vpop.f32.mrf.mxu2 }
  0xbc   : > { %v1997_v27 = vpop.f32.mrf.mxu0  ;;  %v1999_v28 = vpop.f32.mrf.mxu1  ;;  %2470 = vst [vmem:[#allocation19_spill] sm:$0xff] %v2033_v45 }
  0xbd   : > { %2461 = vst [vmem:[#allocation10_spill] sm:$0xff] %v1999_v28  ;;  %v814_v17 = vmax.f32 %v1986_v22, %v1997_v27  ;;  %v851_v18 = vmax.f32 %v1988_v23, %v1999_v28 }
  0xc3   : > { %v2041_v49 = vpop.f32.mrf.mxu3  ;;  %v2043_v50 = vpop.f32.mrf.mxu2 }
  0xc4   : > { %v2001_v29 = vpop.f32.mrf.mxu0  ;;  %v2003_v30 = vpop.f32.mrf.mxu1  ;;  %2471 = vst [vmem:[#allocation20_spill] sm:$0xff] %v2041_v49 }
  0xc5   : > { %2462 = vst [vmem:[#allocation11_spill] sm:$0xff] %v2003_v30  ;;  %v815_v9 = vmax.f32 %v813_v7, %v2001_v29  ;;  %v852_v10 = vmax.f32 %v850_v8, %v2003_v30  ;;  %v456_v30 = vlaneseq }
  0xc7   : > { %vm2125_vm2 = vcmp.lt.s32.totalorder %v456_v30, 256 }
  0xcb   : > { %v2049_v53 = vpop.f32.mrf.mxu3  ;;  %v2051_v54 = vpop.f32.mrf.mxu2 }
  0xcc   : > { %v2005_v31 = vpop.f32.mrf.mxu0  ;;  %v2007_v32 = vpop.f32.mrf.mxu1  ;;  %2472 = vst [vmem:[#allocation21_spill] sm:$0xff] %v2049_v53 }
  0xcd   : > { %2463 = vst [vmem:[#allocation12_spill] sm:$0xff] %v2007_v32 }
  0xd3   : > { %v2057_v57 = vpop.f32.mrf.mxu3  ;;  %v2059_v58 = vpop.f32.mrf.mxu2 }
  0xd4   : > { %v2009_v33 = vpop.f32.mrf.mxu0  ;;  %v2011_v34 = vpop.f32.mrf.mxu1  ;;  %2473 = vst [vmem:[#allocation22_spill] sm:$0xff] %v2057_v57 }
  0xd5   : > { %2464 = vst [vmem:[#allocation13_spill] sm:$0xff] %v2011_v34  ;;  %v817_v11 = vmax.f32 %v815_v9, %v2009_v33  ;;  %v854_v12 = vmax.f32 %v852_v10, %v2011_v34  ;;  %v816_v9 = vmax.f32 %v814_v17, %v2005_v31  ;;  %v853_v10 = vmax.f32 %v851_v18, %v2007_v32 }
  0xdb   : > { %v2069_v63 = vpop.f32.mrf.mxu3  ;;  %v2071_v0 = vpop.f32.mrf.mxu2 }
  0xdc   : > { %v2017_v37 = vpop.f32.mrf.mxu0  ;;  %v2019_v38 = vpop.f32.mrf.mxu1  ;;  %2474 = vst [vmem:[#allocation23_spill] sm:$0xff] %v2069_v63 }
  0xdd   : > { %2466 = vst [vmem:[#allocation15_spill] sm:$0xff] %v2019_v38  ;;  %v818_v21 = vmax.f32 %v816_v9, %v2017_v37  ;;  %v855_v23 = vmax.f32 %v853_v10, %v2019_v38 }
  0xe3   : > { %v2077_v3 = vpop.f32.mrf.mxu3  ;;  %v2079_v4 = vpop.f32.mrf.mxu2 }
  0xe4   : > { %v2025_v41 = vpop.f32.mrf.mxu0  ;;  %v2027_v42 = vpop.f32.mrf.mxu1  ;;  %2475 = vst [vmem:[#allocation24_spill] sm:$0xff] %v2077_v3 }
  0xe5   : > { %v819_v15 = vmax.f32 %v817_v11, %v2025_v41  ;;  %v856_v16 = vmax.f32 %v854_v12, %v2027_v42 }
  0xeb   : > { %v2093_v13 = vpop.f32.mrf.mxu3  ;;  %v2095_v14 = vpop.f32.mrf.mxu2 }
  0xec   : > { %v2029_v43 = vpop.f32.mrf.mxu0  ;;  %v2031_v44 = vpop.f32.mrf.mxu1  ;;  %2477 = vst [vmem:[#allocation26_spill] sm:$0xff] %v2093_v13 }
  0xed   : > { %2469 = vst [vmem:[#allocation18_spill] sm:$0xff] %v2031_v44 }
  0xf4   : > { %v2037_v47 = vpop.f32.mrf.mxu0  ;;  %v2039_v48 = vpop.f32.mrf.mxu1 }
  0xf5   : > { %v821_v7 = vmax.f32 %v819_v15, %v2037_v47  ;;  %v858_v8 = vmax.f32 %v856_v16, %v2039_v48  ;;  %v820_v15 = vmax.f32 %v818_v21, %v2029_v43  ;;  %v857_v16 = vmax.f32 %v855_v23, %v2031_v44 }
  0xfc   : > { %v2045_v51 = vpop.f32.mrf.mxu0  ;;  %v2047_v52 = vpop.f32.mrf.mxu1 }
  0xfd   : > { %v822_v21 = vmax.f32 %v820_v15, %v2045_v51  ;;  %v859_v23 = vmax.f32 %v857_v16, %v2047_v52 }
 0x104   : > { %v2053_v55 = vpop.f32.mrf.mxu0  ;;  %v2055_v56 = vpop.f32.mrf.mxu1 }
 0x105   : > { %v823_v11 = vmax.f32 %v821_v7, %v2053_v55  ;;  %v860_v12 = vmax.f32 %v858_v8, %v2055_v56  ;;  %v2121_v7 = vpop.f32.mrf.mxu3  ;;  %v2123_v8 = vpop.f32.mrf.mxu2 }
 0x106   : > { %2479 = vst [vmem:[#allocation28_spill] sm:$0xff] %v2121_v7 }
 0x10c   : > { %v2061_v59 = vpop.f32.mrf.mxu0  ;;  %v2063_v60 = vpop.f32.mrf.mxu1 }
 0x10d   : > { %v824_v30 = vmax.f32 %v822_v21, %v2061_v59 }
 0x114   : > { %v2065_v61 = vpop.f32.mrf.mxu0  ;;  %v2067_v62 = vpop.f32.mrf.mxu1 }
 0x115   : > { %v825_v28 = vmax.f32 %v823_v11, %v2065_v61  ;;  %v862_v26 = vmax.f32 %v860_v12, %v2067_v62  ;;  %v1832_v12 = vmov -inf  }
 0x116   : > { %460 = vst.msk [vmem:[#allocation2] sm:$0x3] %vm2125_vm2, %v1832_v12 }
 0x11c   : > { %v2073_v1 = vpop.f32.mrf.mxu0  ;;  %v2075_v2 = vpop.f32.mrf.mxu1 }
 0x11d   : > { %v826_v34 = vmax.f32 %v824_v30, %v2073_v1  ;;  %v2157_v30 = vpop.f32.mrf.mxu3 }
 0x124   : > { %v2081_v5 = vpop.f32.mrf.mxu0  ;;  %v2083_v6 = vpop.f32.mrf.mxu1 }
 0x125   : > { %2476 = vst [vmem:[#allocation25_spill] sm:$0xff] %v2081_v5  ;;  %v827_v17 = vmax.f32 %v825_v28, %v2081_v5  ;;  %v864_v18 = vmax.f32 %v862_v26, %v2083_v6  ;;  %v861_v5 = vmax.f32 %v859_v23, %v2063_v60 }
 0x127   : > { %v863_v12 = vmax.f32 %v861_v5, %v2075_v2 }
 0x12c   : > { %v2103_v19 = vpop.f32.mrf.mxu0  ;;  %v2105_v24 = vpop.f32.mrf.mxu1 }
 0x12d   : > { %2478 = vst [vmem:[#allocation27_spill] sm:$0xff] %v2103_v19 }
 0x134   : > { %v2129_v10 = vpop.f32.mrf.mxu0  ;;  %v2131_v11 = vpop.f32.mrf.mxu1 }
 0x135   : > { %v829_v26 = vmax.f32 %v827_v17, %v2129_v10  ;;  %v866_v28 = vmax.f32 %v864_v18, %v2131_v11  ;;  %v828_v17 = vmax.f32 %v826_v34, %v2103_v19  ;;  %v865_v18 = vmax.f32 %v863_v12, %v2105_v24 }
 0x137   : > { %v831_v32 = vmax.f32 %v829_v26, %v2015_v36  ;;  %v868_v38 = vmax.f32 %v866_v28, %v2013_v35 }
 0x139   : > { %v833_v15 = vmax.f32 %v831_v32, %v2035_v46  ;;  %v870_v16 = vmax.f32 %v868_v38, %v2033_v45  ;;  %v2159_v32 = vpop.f32.mrf.mxu2 }
 0x13b   : > { %v872_v23 = vmax.f32 %v870_v16, %v2049_v53  ;;  %v835_v26 = vmax.f32 %v833_v15, %v2051_v54 }
 0x13c   : > { %v2149_v44 = vpop.f32.mrf.mxu0  ;;  %v2151_v21 = vpop.f32.mrf.mxu1 }
 0x13d   : > { %v830_v28 = vmax.f32 %v828_v17, %v2149_v44  ;;  %v867_v5 = vmax.f32 %v865_v18, %v2151_v21  ;;  %v874_v12 = vmax.f32 %v872_v23, %v2069_v63  ;;  %v837_v35 = vmax.f32 %v835_v26, %v2071_v0 }
 0x13f   : > { %v832_v34 = vmax.f32 %v830_v28, %v2023_v40  ;;  %v869_v38 = vmax.f32 %v867_v5, %v2021_v39  ;;  %v876_v45 = vmax.f32 %v874_v12, %v2093_v13  ;;  %v839_v53 = vmax.f32 %v837_v35, %v2095_v14  ;;  %v2175_v39 = vpop.f32.mrf.mxu3 }
 0x140   : > { %2482 = vst [vmem:[#allocation29_spill] sm:$0xff] %v2175_v39 }
 0x141   : > { %v834_v16 = vmax.f32 %v832_v34, %v2043_v50  ;;  %v871_v15 = vmax.f32 %v869_v38, %v2041_v49  ;;  %v2177_v34 = vpop.f32.mrf.mxu2  ;;  %v878_v38 = vmax.f32 %v876_v45, %v2157_v30 }
 0x143   : > { %v836_v17 = vmax.f32 %v834_v16, %v2059_v58  ;;  %v873_v18 = vmax.f32 %v871_v15, %v2057_v57  ;;  %v841_v16 = vmax.f32 %v839_v53, %v2159_v32  ;;  %v2183_v53 = vld [vmem:[#allocation2] sm:$0x3] }
 0x145   : > { %v875_v28 = vmax.f32 %v873_v18, %v2077_v3  ;;  %v838_v5 = vmax.f32 %v836_v17, %v2079_v4 }
 0x147   : > { %v877_v23 = vmax.f32 %v875_v28, %v2121_v7  ;;  %v840_v26 = vmax.f32 %v838_v5, %v2123_v8 }
 0x149   : > { %v879_v12 = vmax.f32 %v877_v23, %v2175_v39  ;;  %v842_v35 = vmax.f32 %v840_v26, %v2177_v34 }
 0x14b   : > { %v880_v15 = vmax.f32 %v878_v38, %v879_v12  ;;  %v843_v18 = vmax.f32 %v841_v16, %v842_v35 }
 0x14d   : > { %v881_v49 = vrot.slane %v880_v15, 4  ;;  %v844_v17 = vrot.slane %v843_v18, 4 }
 0x14f   : > { %v882_v57 = vmax.f32 %v880_v15, %v881_v49  ;;  %v845_v28 = vmax.f32 %v843_v18, %v844_v17 }
 0x151   : > { %v883_v3 = vrot.slane %v882_v57, 2  ;;  %v846_v5 = vrot.slane %v845_v28, 2 }
 0x153   : > { %v884_v63 = vmax.f32 %v882_v57, %v883_v3  ;;  %v847_v7 = vmax.f32 %v845_v28, %v846_v5 }
 0x155   : > { %v885_v13 = vrot.slane %v884_v63, 1  ;;  %v848_v19 = vrot.slane %v847_v7, 1 }
 0x157   : > { %v886_v40 = vmax.f32 %v884_v63, %v885_v13  ;;  %v849_v23 = vmax.f32 %v847_v7, %v848_v19 }
 0x159   : > { %v889_v45 = vrot.slane %v886_v40, 7 }
 0x15b   : > { %v891_v39 = vsel %vm890_vm3, %v849_v23, %v889_v45 }
 0x15c   : > { %v2186_v26 = vmax.f32 %v2183_v53, %v891_v39 }
 0x15e   : > { %1203 = vst.msk [vmem:[#allocation2] sm:$0x3] %vm2125_vm2, %v2186_v26  ;;  %v2192_v49 = vperm.slane %v2186_v26, 1  ;;  %v2201_v3 = vperm.slane %v2186_v26, 0 }
 0x160   : > { %v937_v57 = vsub.f32 %v2105_v24, %v2192_v49  ;;  %v939_v40 = vsub.f32 %v2131_v11, %v2192_v49  ;;  %v941_v63 = vsub.f32 %v2151_v21, %v2192_v49  ;;  %v918_v39 = vsub.f32 %v2025_v41, %v2201_v3 }
 0x161   : > { %v930_v13 = vsub.f32 %v2065_v61, %v2201_v3  ;;  %v922_v19 = vsub.f32 %v2037_v47, %v2201_v3  ;;  %v932_v24 = vsub.f32 %v2073_v1, %v2201_v3  ;;  %v926_v7 = vsub.f32 %v2053_v55, %v2201_v3 }
 0x162   : > { %v998_v9 = vmul.f32 1.442695, %v918_v39  ;;  %v928_v11 = vsub.f32 %v2061_v59, %v2201_v3  ;;  %v894_v41 = vsub.f32 %v2183_v53, %v2186_v26  ;;  %v935_v61 = vsub.f32 %v2083_v6, %v2192_v49  ;;  %v1215_v26 = vld [vmem:[%s442_s12] sm:$0x3] }
 0x163   : > { %v1022_v21 = vmul.f32 1.442695, %v930_v13  ;;  %v1006_v38 = vmul.f32 1.442695, %v922_v19  ;;  %v924_v47 = vsub.f32 %v2045_v51, %v2201_v3  ;;  %v1026_v16 = vmul.f32 1.442695, %v932_v24 }
 0x164   : > { %1618 = vpow2.f32 %v998_v9  ;;  %v1014_v1 = vmul.f32 1.442695, %v926_v7  ;;  %v938_v55 = vsub.f32 %v2129_v10, %v2201_v3  ;;  %v1018_v12 = vmul.f32 1.442695, %v928_v11 }
 0x165   : > { %1620 = vpow2.f32 %v1022_v21  ;;  %v1032_v59 = vmul.f32 1.442695, %v935_v61  ;;  %v940_v35 = vsub.f32 %v2149_v44, %v2201_v3  ;;  %v1010_v15 = vmul.f32 1.442695, %v924_v47 }
 0x166   : > { %1622 = vpow2.f32 %v1006_v38  ;;  %v1036_v6 = vmul.f32 1.442695, %v937_v57  ;;  %v920_v51 = vsub.f32 %v2029_v43, %v2201_v3  ;;  %v1038_v18 = vmul.f32 1.442695, %v938_v55 }
 0x167   : > { %1624 = vpow2.f32 %v1026_v16  ;;  %v1040_v10 = vmul.f32 1.442695, %v939_v40  ;;  %v1042_v5 = vmul.f32 1.442695, %v940_v35  ;;  %v914_v44 = vsub.f32 %v2009_v33, %v2201_v3 }
 0x168   : > { %1626 = vpow2.f32 %v1014_v1  ;;  %v1044_v23 = vmul.f32 1.442695, %v941_v63  ;;  %v916_v57 = vsub.f32 %v2017_v37, %v2201_v3  ;;  %v1002_v43 = vmul.f32 1.442695, %v920_v51 }
 0x169   : > { %1628 = vpow2.f32 %v1018_v12  ;;  %v910_v7 = vsub.f32 %v2001_v29, %v2201_v3  ;;  %v990_v9 = vmul.f32 1.442695, %v914_v44  ;;  %v912_v63 = vsub.f32 %v2005_v31, %v2201_v3 }
 0x16a   : > { %v2227_v17 = vpop.eup %1618  ;;  %1630 = vpow2.f32 %v1032_v59  ;;  %v994_v37 = vmul.f32 1.442695, %v916_v57  ;;  %v906_v29 = vsub.f32 %v1991_v25, %v2201_v3  ;;  %v908_v31 = vsub.f32 %v1997_v27, %v2201_v3 }
 0x16b   : > { %v1621_v28 = vpop.eup %1620  ;;  %1632 = vpow2.f32 %v1010_v15  ;;  %v982_v16 = vmul.f32 1.442695, %v910_v7  ;;  %v986_v55 = vmul.f32 1.442695, %v912_v63  ;;  %v964_v59 = vsub.f32 %v2177_v34, %v2201_v3 }
 0x16c   : > { %v1623_v45 = vpop.eup %1622  ;;  %1634 = vpow2.f32 %v1036_v6  ;;  %v902_v6 = vsub.f32 %v1980_v20, %v2201_v3  ;;  %v904_v27 = vsub.f32 %v1986_v22, %v2201_v3  ;;  %v931_v34 = vsub.f32 %v2067_v62, %v2192_v49 }
 0x16d   : > { %v1625_v39 = vpop.eup %1624  ;;  %1636 = vpow2.f32 %v1038_v18  ;;  %v974_v18 = vmul.f32 1.442695, %v906_v29  ;;  %v962_v62 = vsub.f32 %v2159_v32, %v2201_v3  ;;  %v923_v7 = vsub.f32 %v2039_v48, %v2192_v49 }
 0x16e   : > { %v1627_v13 = vpop.eup %1626  ;;  %1638 = vpow2.f32 %v1040_v10  ;;  %v1108_v19 = vpack.c.bf16 %v1625_v39, %v1621_v28  ;;  %v978_v10 = vmul.f32 1.442695, %v908_v31  ;;  %v966_v22 = vmul.f32 1.442695, %v902_v6 }
 0x16f   : > { %v1629_v24 = vpop.eup %1628  ;;  %1640 = vpow2.f32 %v1042_v5  ;;  %v1090_v5 = vmul.f32 1.442695, %v964_v59  ;;  %v929_v39 = vsub.f32 %v2063_v60, %v2192_v49  ;;  %v970_v57 = vmul.f32 1.442695, %v904_v27 }
 0x170   : > { %v2233_v40 = vpop.eup %1630  ;;  %1642 = vpow2.f32 %v1044_v23  ;;  %1143 = vmatpush.bf16.msrb.mxu2 %v1108_v19  ;;  %v1106_v21 = vpack.c.bf16 %v1629_v24, %v1627_v13  ;;  %v927_v23 = vsub.f32 %v2055_v56, %v2192_v49  ;;  %v960_v24 = vsub.f32 %v2123_v8, %v2201_v3 }
 0x171   : > { %v1633_v33 = vpop.eup %1632  ;;  %1644 = vpow2.f32 %v1002_v43  ;;  %v1024_v43 = vmul.f32 1.442695, %v931_v34  ;;  %v1020_v32 = vmul.f32 1.442695, %v929_v39  ;;  %v954_v63 = vsub.f32 %v2071_v0, %v2201_v3  ;;  %v2483_v0 = vld [vmem:[#allocation18_spill] sm:$0xff] }
 0x172   : > { %v2239_v11 = vpop.eup %1634  ;;  %1646 = vpow2.f32 %v990_v9  ;;  %v1104_v35 = vpack.c.bf16 %v1633_v33, %v1623_v45  ;;  %v933_v45 = vsub.f32 %v2075_v2, %v2192_v49  ;;  %v958_v2 = vsub.f32 %v2095_v14, %v2201_v3 }
 0x173   : > { %v2241_v61 = vpop.eup %1636  ;;  %v1111_v38 = vpack.c.bf16 %v2239_v11, %v2233_v40  ;;  %1648 = vpow2.f32 %v994_v37  ;;  %v1016_v60 = vmul.f32 1.442695, %v927_v23  ;;  %v925_v9 = vsub.f32 %v2047_v52, %v2192_v49 }
 0x174   : > { %v2245_v47 = vpop.eup %1638  ;;  %1144 = vmatpush.bf16.msrb.mxu2 %v1106_v21  ;;  %1650 = vpow2.f32 %v982_v16  ;;  %v1086_v14 = vmul.f32 1.442695, %v962_v62  ;;  %v1078_v8 = vmul.f32 1.442695, %v958_v2  ;;  %v956_v48 = vsub.f32 %v2079_v4, %v2201_v3 }
 0x175   : > { %v2249_v1 = vpop.eup %1640  ;;  %1652 = vpow2.f32 %v986_v55  ;;  %v1082_v29 = vmul.f32 1.442695, %v960_v24  ;;  %v919_v52 = vsub.f32 %v2027_v42, %v2192_v49  ;;  %v1008_v31 = vmul.f32 1.442695, %v923_v7 }
 0x176   : > { %v2253_v12 = vpop.eup %1642  ;;  %v1112_v15 = vpack.c.bf16 %v2249_v1, %v2241_v61  ;;  %1654 = vpow2.f32 %v974_v18  ;;  %v921_v59 = vsub.f32 %v2483_v0, %v2192_v49  ;;  %v950_v4 = vsub.f32 %v2051_v54, %v2201_v3  ;;  %v2504_v61 = vld [vmem:[#allocation14_spill] sm:$0xff] }
 0x177   : > { %v1645_v25 = vpop.eup %1644  ;;  %v1113_v51 = vpack.c.bf16 %v2253_v12, %v2245_v47  ;;  %1656 = vpow2.f32 %v978_v10  ;;  %v1070_v6 = vmul.f32 1.442695, %v954_v63  ;;  %v952_v42 = vsub.f32 %v2059_v58, %v2201_v3 }
 0x178   : > { %1145 = vmatpush.bf16.msrb.mxu2 %v1104_v35  ;;  %v1647_v28 = vpop.eup %1646  ;;  %v1102_v20 = vpack.c.bf16 %v1645_v25, %v2227_v17  ;;  %1658 = vpow2.f32 %v1090_v5  ;;  %v1028_v17 = vmul.f32 1.442695, %v933_v45  ;;  %v1012_v35 = vmul.f32 1.442695, %v925_v9 }
 0x179   : > { %v1649_v44 = vpop.eup %1648  ;;  %1660 = vpow2.f32 %v966_v22  ;;  %v1074_v34 = vmul.f32 1.442695, %v956_v48  ;;  %v1000_v45 = vmul.f32 1.442695, %v919_v52  ;;  %v946_v58 = vsub.f32 %v2035_v46, %v2201_v3  ;;  %v2486_v46 = vld [vmem:[#allocation11_spill] sm:$0xff]  ;;  %v2488_v48 = vld [vmem:[#allocation17_spill] sm:$0xff] }
 0x17a   : > { %v1651_v13 = vpop.eup %1650  ;;  %v1100_v19 = vpack.c.bf16 %v1649_v44, %v1647_v28  ;;  %1662 = vpow2.f32 %v970_v57  ;;  %v2484_v28 = vld [vmem:[#allocation13_spill] sm:$0xff]  ;;  %v1004_v23 = vmul.f32 1.442695, %v921_v59  ;;  %v948_v39 = vsub.f32 %v2043_v50, %v2201_v3 }
 0x17b   : > { %v1653_v56 = vpop.eup %1652  ;;  %1664 = vpow2.f32 %v1024_v43  ;;  %v915_v5 = vsub.f32 %v2484_v28, %v2192_v49  ;;  %v1062_v57 = vmul.f32 1.442695, %v950_v4  ;;  %v2310_v43 = vld [vmem:[%s423_s27] sm:$0xff]  ;;  %v1066_v2 = vmul.f32 1.442695, %v952_v42  ;;  %s1256_s27 = sshll.u32 %s394_s19, 4  ;;  %s1257_s27 = int_to_ptr.vmem [resolvable:$true] %s1256_s27 }
 0x17c   : > { %1146 = vmatpush.bf16.msrb.mxu2 %v1102_v20  ;;  %v1655_v33 = vpop.eup %1654  ;;  %1666 = vpow2.f32 %v1028_v17  ;;  %v1098_v37 = vpack.c.bf16 %v1653_v56, %v1651_v13  ;;  %v2485_v20 = vld [vmem:[#allocation15_spill] sm:$0xff]  ;;  %v911_v24 = vsub.f32 %v2486_v46, %v2192_v49  ;;  %v943_v1 = vsub.f32 %v2504_v61, %v2192_v49 }
 0x17d   : > { %v1657_v21 = vpop.eup %1656  ;;  %1668 = vpow2.f32 %v1016_v60  ;;  %v917_v44 = vsub.f32 %v2485_v20, %v2192_v49  ;;  %v992_v60 = vmul.f32 1.442695, %v915_v5 }
 0x17e   : > { %v1659_v16 = vpop.eup %1658  ;;  %1670 = vpow2.f32 %v1020_v32  ;;  %v1096_v27 = vpack.c.bf16 %v1657_v21, %v1655_v33  ;;  %v2487_v32 = vld [vmem:[#allocation12_spill] sm:$0xff] }
 0x17f   : > { %v1661_v55 = vpop.eup %1660  ;;  %1672 = vpow2.f32 %v1086_v14  ;;  %v913_v9 = vsub.f32 %v2487_v32, %v2192_v49  ;;  %v996_v14 = vmul.f32 1.442695, %v917_v44 }
 0x180   : > { %1147 = vmatpush.bf16.msrb.mxu2 %v1100_v19  ;;  %v1663_v25 = vpop.eup %1662  ;;  %1674 = vpow2.f32 %v1078_v8  ;;  %v1137_v19 = vunpack.c.l.b16 %v2310_v43  ;;  %v942_v8 = vsub.f32 %v2015_v36, %v2201_v3 }
 0x181   : > { %v1665_v18 = vpop.eup %1664  ;;  %1676 = vpow2.f32 %v1082_v29  ;;  %v1094_v62 = vpack.c.bf16 %v1663_v25, %v1661_v55  ;;  %v944_v29 = vsub.f32 %v2488_v48, %v2201_v3  ;;  %v984_v55 = vmul.f32 1.442695, %v911_v24 }
 0x182   : > { %v1667_v10 = vpop.eup %1666  ;;  %1678 = vpow2.f32 %v1008_v31  ;;  %v2317_v33 = vpack.c.b16 %v1137_v19, %v1137_v19  ;;  %v988_v25 = vmul.f32 1.442695, %v913_v9  ;;  %v963_v19 = vsub.f32 %v2157_v30, %v2192_v49  ;;  %v2496_v30 = vld [vmem:[#allocation26_spill] sm:$0xff] }
 0x183   : > { %v1669_v54 = vpop.eup %1668  ;;  %1680 = vpow2.f32 %v1012_v35  ;;  %v1109_v17 = vpack.c.bf16 %v1667_v10, %v1665_v18  ;;  %v2489_v35 = vld [vmem:[#allocation9_spill] sm:$0xff]  ;;  %v1046_v18 = vmul.f32 1.442695, %v942_v8  ;;  %v1050_v28 = vmul.f32 1.442695, %v944_v29 }
 0x184   : > { %1148 = vmatpush.bf16.msrb.mxu2 %v1098_v37  ;;  %v1671_v22 = vpop.eup %1670  ;;  %1682 = vpow2.f32 %v1070_v6  ;;  %v1054_v37 = vmul.f32 1.442695, %v946_v58  ;;  %v907_v36 = vsub.f32 %v2489_v35, %v2192_v49  ;;  %v2490_v6 = vld [vmem:[#allocation10_spill] sm:$0xff]  ;;  %v2498_v35 = vld [vmem:[#allocation23_spill] sm:$0xff] }
 0x185   : > { %v1673_v13 = vpop.eup %1672  ;;  %1684 = vpow2.f32 %v1074_v34  ;;  %v1107_v52 = vpack.c.bf16 %v1671_v22, %v1669_v54  ;;  %v2491_v34 = vld [vmem:[#allocation7_spill] sm:$0xff]  ;;  %v2492_v54 = vld [vmem:[#allocation8_spill] sm:$0xff] }
 0x186   : > { %v1675_v56 = vpop.eup %1674  ;;  %1686 = vpow2.f32 %v1000_v45  ;;  %v1124_v7 = vpack.c.bf16 %v1659_v16, %v1673_v13  ;;  %v1058_v16 = vmul.f32 1.442695, %v948_v39  ;;  %v903_v10 = vsub.f32 %v2491_v34, %v2192_v49 }
 0x187   : > { %v1677_v50 = vpop.eup %1676  ;;  %1688 = vpow2.f32 %v1004_v23  ;;  %v905_v20 = vsub.f32 %v2492_v54, %v2192_v49  ;;  %v2493_v23 = vld [vmem:[#allocation25_spill] sm:$0xff]  ;;  %v976_v39 = vmul.f32 1.442695, %v907_v36  ;;  %v955_v36 = vsub.f32 %v2498_v35, %v2192_v49 }
 0x188   : > { %1149 = vmatpush.bf16.msrb.mxu2 %v1096_v27  ;;  %v1679_v63 = vpop.eup %1678  ;;  %1690 = vpow2.f32 %v1062_v57  ;;  %1156 = vmatpush.bf16.msrb.mxu3 %v1124_v7  ;;  %v1122_v0 = vpack.c.bf16 %v1677_v50, %v1675_v56  ;;  %v909_v27 = vsub.f32 %v2490_v6, %v2192_v49  ;;  %v934_v22 = vsub.f32 %v2493_v23, %v2201_v3  ;;  %v2501_v23 = vld [vmem:[#allocation22_spill] sm:$0xff] }
 0x189   : > { %v1681_v21 = vpop.eup %1680  ;;  %1692 = vpow2.f32 %v1066_v2  ;;  %v968_v56 = vmul.f32 1.442695, %v903_v10  ;;  %v972_v50 = vmul.f32 1.442695, %v905_v20  ;;  %v1072_v20 = vmul.f32 1.442695, %v955_v36 }
 0x18a   : > { %v1683_v31 = vpop.eup %1682  ;;  %1694 = vpow2.f32 %v992_v60  ;;  %v1105_v5 = vpack.c.bf16 %v1681_v21, %v1679_v63  ;;  %v980_v2 = vmul.f32 1.442695, %v909_v27  ;;  %v2495_v60 = vld [vmem:[#allocation29_spill] sm:$0xff]  ;;  %v1088_v21 = vmul.f32 1.442695, %v963_v19  ;;  %v2499_v27 = vld [vmem:[#allocation24_spill] sm:$0xff] }
 0x18b   : > { %v1685_v59 = vpop.eup %1684  ;;  %1696 = vpow2.f32 %v996_v14  ;;  %v965_v7 = vsub.f32 %v2495_v60, %v2192_v49  ;;  %v1030_v14 = vmul.f32 1.442695, %v934_v22  ;;  %v953_v22 = vsub.f32 %v2501_v23, %v2192_v49 }
 0x18c   : > { %1150 = vmatpush.bf16.msrb.mxu2 %v1094_v62  ;;  %v1687_v4 = vpop.eup %1686  ;;  %1698 = vpow2.f32 %v1054_v37  ;;  %1157 = vmatpush.bf16.msrb.mxu3 %v1122_v0  ;;  %v1120_v44 = vpack.c.bf16 %v1685_v59, %v1683_v31  ;;  %v2494_v62 = vld [vmem:[#allocation27_spill] sm:$0xff]  ;;  %v959_v37 = vsub.f32 %v2496_v30, %v2192_v49 }
 0x18d   : > { %v1689_v42 = vpop.eup %1688  ;;  %1700 = vpow2.f32 %v1058_v16  ;;  %v936_v13 = vsub.f32 %v2494_v62, %v2201_v3  ;;  %v2497_v16 = vld [vmem:[#allocation28_spill] sm:$0xff]  ;;  %v1092_v31 = vmul.f32 1.442695, %v965_v7  ;;  %v1138_v62 = vunpack.c.h.b16 %v2310_v43 }
 0x18e   : > { %v1691_v45 = vpop.eup %1690  ;;  %1702 = vpow2.f32 %v984_v55  ;;  %v1103_v46 = vpack.c.bf16 %v1689_v42, %v1687_v4  ;;  %v1068_v60 = vmul.f32 1.442695, %v953_v22 }
 0x18f   : > { %1151 = vmatmul.bf16.vlgmr.msrb.gmra.mxu2 %v2317_v33  ;;  %v1693_v58 = vpop.eup %1692  ;;  %1704 = vpow2.f32 %v988_v25  ;;  %v1034_v63 = vmul.f32 1.442695, %v936_v13  ;;  %v1080_v25 = vmul.f32 1.442695, %v959_v37 }
 0x190   : > { %1169 = vmatpush.bf16.msra.mxu2 %v1109_v17  ;;  %v1695_v57 = vpop.eup %1694  ;;  %1706 = vpow2.f32 %v1046_v18  ;;  %1158 = vmatpush.bf16.msrb.mxu3 %v1120_v44  ;;  %v1118_v32 = vpack.c.bf16 %v1693_v58, %v1691_v45  ;;  %v957_v18 = vsub.f32 %v2499_v27, %v2192_v49  ;;  %v2500_v45 = vld [vmem:[#allocation21_spill] sm:$0xff]  ;;  %v895_v27 = vmul.f32 1.442695, %v894_v41 }
 0x191   : > { %v1697_v17 = vpop.eup %1696  ;;  %1708 = vpow2.f32 %v1050_v28  ;;  %v951_v54 = vsub.f32 %v2500_v45, %v2192_v49  ;;  %v1219_v41 = vperm.slane %v1215_v26, 1 }
 0x192   : > { %v1699_v24 = vpop.eup %1698  ;;  %1710 = vpow2.f32 %v976_v39  ;;  %v1101_v48 = vpack.c.bf16 %v1697_v17, %v1695_v57  ;;  %v1076_v39 = vmul.f32 1.442695, %v957_v18 }
 0x193   : > { %v1701_v9 = vpop.eup %1700  ;;  %1712 = vpow2.f32 %v980_v2  ;;  %v2502_v2 = vld [vmem:[#allocation19_spill] sm:$0xff]  ;;  %v1064_v19 = vmul.f32 1.442695, %v951_v54 }
 0x194   : > { %1170 = vmatpush.bf16.msra.mxu2 %v1107_v52  ;;  %v1703_v3 = vpop.eup %1702  ;;  %1159 = vmatpush.bf16.msrb.mxu3 %v1118_v32  ;;  %1714 = vpow2.f32 %v968_v56  ;;  %v961_v52 = vsub.f32 %v2497_v16, %v2192_v49  ;;  %v1116_v55 = vpack.c.bf16 %v1701_v9, %v1699_v24  ;;  %v947_v17 = vsub.f32 %v2502_v2, %v2192_v49 }
 0x195   : > { %v1705_v8 = vpop.eup %1704  ;;  %1716 = vpow2.f32 %v972_v50  ;;  %v1140_v32 = vpack.c.b16 %v1138_v62, %v1138_v62 }
 0x196   : > { %v1707_v29 = vpop.eup %1706  ;;  %1718 = vpow2.f32 %v1030_v14  ;;  %v1099_v4 = vpack.c.bf16 %v1705_v8, %v1703_v3  ;;  %v1084_v42 = vmul.f32 1.442695, %v961_v52  ;;  %v2505_v14 = vld [vmem:[#allocation16_spill] sm:$0xff] }
 0x197   : > { %v1709_v0 = vpop.eup %1708  ;;  %1720 = vpow2.f32 %v1034_v63  ;;  %v945_v3 = vsub.f32 %v2505_v14, %v2192_v49 }
 0x198   : > { %1171 = vmatpush.bf16.msra.mxu2 %v1105_v5  ;;  %1160 = vmatpush.bf16.msrb.mxu3 %v1116_v55  ;;  %v1711_v59 = vpop.eup %1710  ;;  %1722 = vpow2.f32 %v1088_v21  ;;  %v1114_v34 = vpack.c.bf16 %v1709_v0, %v1707_v29  ;;  %v1048_v21 = vmul.f32 1.442695, %v943_v1 }
 0x199   : > { %v1713_v6 = vpop.eup %1712  ;;  %1724 = vpow2.f32 %v1092_v31 }
 0x19a   : > { %v1715_v10 = vpop.eup %1714  ;;  %1726 = vpow2.f32 %v1080_v25  ;;  %v1097_v44 = vpack.c.bf16 %v1713_v6, %v1711_v59 }
 0x19b   : > { %v1717_v28 = vpop.eup %1716  ;;  %1728 = vpow2.f32 %v1084_v42 }
 0x19c   : > { %1172 = vmatpush.bf16.msra.mxu2 %v1103_v46  ;;  %1161 = vmatpush.bf16.msrb.mxu3 %v1114_v34  ;;  %v1719_v5 = vpop.eup %1718  ;;  %1730 = vpow2.f32 %v1072_v20  ;;  %v1095_v56 = vpack.c.bf16 %v1717_v28, %v1715_v10  ;;  %v2503_v46 = vld [vmem:[#allocation20_spill] sm:$0xff]  ;;  %v1225_v20 = vsub.f32 1.0, %v1215_v26 }
 0x19d   : > { %v1721_v58 = vpop.eup %1720  ;;  %v949_v24 = vsub.f32 %v2503_v46, %v2192_v49  ;;  %1732 = vpow2.f32 %v1076_v39 }
 0x19e   : > { %v1723_v57 = vpop.eup %1722  ;;  %v1110_v7 = vpack.c.bf16 %v1721_v58, %v1719_v5  ;;  %1734 = vpow2.f32 %v1064_v19  ;;  %v1220_v58 = vrot.slane %v1219_v41, 4  ;;  %v1228_v39 = vperm.slane %v1225_v20, 1 }
 0x19f   : > { %v1725_v13 = vpop.eup %1724  ;;  %v1060_v63 = vmul.f32 1.442695, %v949_v24  ;;  %1736 = vpow2.f32 %v1068_v60 }
 0x1a0   : > { %1173 = vmatpush.bf16.msra.mxu2 %v1101_v48  ;;  %1162 = vmatpush.bf16.msrb.mxu3 %v1112_v15  ;;  %v1727_v50 = vpop.eup %1726  ;;  %v1125_v43 = vpack.c.bf16 %v1725_v13, %v1723_v57  ;;  %v1056_v15 = vmul.f32 1.442695, %v947_v17  ;;  %v1052_v48 = vmul.f32 1.442695, %v945_v3  ;;  %v1216_v57 = vld [vmem:[%s433_s16] sm:$0xff]  ;;  %v1227_v13 = vperm.slane %v1225_v20, 0 }
 0x1a1   : > { %v1729_v9 = vpop.eup %1728 }
 0x1a2   : > { %v1731_v8 = vpop.eup %1730  ;;  %v1123_v30 = vpack.c.bf16 %v1729_v9, %v1727_v50  ;;  %1738 = vpow2.f32 %v1056_v15 }
 0x1a3   : > { %v1733_v37 = vpop.eup %1732  ;;  %1740 = vpow2.f32 %v1060_v63 }
 0x1a4   : > { %1174 = vmatpush.bf16.msra.mxu2 %v1099_v4  ;;  %1163 = vmatpush.bf16.msrb.mxu3 %v1110_v7  ;;  %v1735_v29 = vpop.eup %1734  ;;  %v1121_v16 = vpack.c.bf16 %v1733_v37, %v1731_v8  ;;  %1742 = vpow2.f32 %v1048_v21 }
 0x1a5   : > { %v1737_v52 = vpop.eup %1736  ;;  %1744 = vpow2.f32 %v1052_v48 }
 0x1a6   : > { %v1119_v31 = vpack.c.bf16 %v1737_v52, %v1735_v29  ;;  %1746 = vpow2.f32 %v895_v27 }
 0x1a7   : > { %1164 = vmatmul.bf16.vlgmr.msrb.gmra.mxu3 %v1140_v32 }
 0x1a8   : > { %1175 = vmatpush.bf16.msra.mxu2 %v1097_v44  ;;  %1182 = vmatpush.bf16.msra.mxu3 %v1125_v43  ;;  %v1739_v49 = vpop.eup %1738  ;;  %v1218_v44 = vperm.slane %v1215_v26, 0 }
 0x1a9   : > { %v1741_v55 = vpop.eup %1740 }
 0x1aa   : > { %v1117_v0 = vpack.c.bf16 %v1741_v55, %v1739_v49  ;;  %v1222_v17 = vsel %vm1221_vm4, %v1218_v44, %v1220_v58 }
 0x1ac   : > { %1176 = vmatpush.bf16.msra.mxu2 %v1095_v56  ;;  %1183 = vmatpush.bf16.msra.mxu3 %v1123_v30  ;;  %v1224_v56 = vmul.f32 %v1222_v17, %v1216_v57 }
 0x1af   : > { %1177 = vmatmul.bf16.vlgmr.msra.gmra.mxu2 %v2317_v33  ;;  %v1743_v33 = vpop.eup %1742 }
 0x1b0   : > { %1184 = vmatpush.bf16.msra.mxu3 %v1121_v16  ;;  %v1745_v59 = vpop.eup %1744 }
 0x1b1   : > { %v1115_v35 = vpack.c.bf16 %v1745_v59, %v1743_v33  ;;  %v1747_v34 = vpop.eup %1746 }
 0x1b2   : > { %v1129_v47 = vperm.slane %v1747_v34, 0  ;;  %v1130_v11 = vperm.slane %v1747_v34, 1 }
 0x1b4   : > { %1185 = vmatpush.bf16.msra.mxu3 %v1119_v31  ;;  %v1134_v10 = vmul.f32 0.0, %v1130_v11 }
 0x1b8   : > { %1186 = vmatpush.bf16.msra.mxu3 %v1117_v0 }
 0x1bc   : > { %1187 = vmatpush.bf16.msra.mxu3 %v1115_v35 }
 0x1c0   : > { %1188 = vmatpush.bf16.msra.mxu3 %v1113_v51  ;;  %v1133_v51 = vmul.f32 0.0, %v1129_v47 }
 0x1c4   : > { %1189 = vmatpush.bf16.msra.mxu3 %v1111_v38 }
 0x1c7   : > { %1190 = vmatmul.bf16.vlgmr.msra.gmra.mxu3 %v1140_v32 }
 0x212   : > { %v1152_v36 = vpop.f32.mrf.mxu2 }
 0x21a   : > { %v1154_v25 = vpop.f32.mrf.mxu2 }
 0x22a   : > { %v1165_v6 = vpop.f32.mrf.mxu3 }
 0x22b   : > { %v1166_v12 = vadd.f32 %v1165_v6, %v1152_v36 }
 0x22d   : > { %v1195_v40 = vadd.f32 %v1166_v12, %v1133_v51 }
 0x22f   : > { %1748 = vrcp.f32 %v1195_v40 }
 0x232   : > { %v1178_v4 = vpop.f32.mrf.mxu2  ;;  %v1167_v42 = vpop.f32.mrf.mxu3 }
 0x235   : > { %v1749_v5 = vpop.eup %1748 }
 0x236   : > { %v1211_v54 = vperm.slane %v1749_v5, 4 }
 0x238   : > { %v1213_v62 = vmul.f32 %v1211_v54, %v1195_v40 }
 0x23a   : > { %v1180_v18 = vpop.f32.mrf.mxu2  ;;  %v1231_v46 = vmul.f32 %v1227_v13, %v1213_v62 }
 0x24a   : > { %v1191_v38 = vpop.f32.mrf.mxu3 }
 0x24b   : > { %v1192_v28 = vadd.f32 %v1191_v38, %v1178_v4 }
 0x24d   : > { %v1196_v53 = vadd.f32 %v1192_v28, %v1134_v10 }
 0x24f   : > { %1750 = vrcp.f32 %v1196_v53 }
 0x252   : > { %v1193_v45 = vpop.f32.mrf.mxu3 }
 0x255   : > { %v1751_v23 = vpop.eup %1750 }
 0x256   : > { %v1212_v22 = vperm.slane %v1751_v23, 4 }
 0x258   : > { %v1214_v2 = vmul.f32 %v1212_v22, %v1196_v53 }
 0x25a   : > { %v1232_v19 = vmul.f32 %v1228_v39, %v1214_v2 }
 0x25c   : > { %v1235_v24 = vrot.slane %v1232_v19, 4 }
 0x25e   : > { %v1236_v60 = vsel %vm1221_vm4, %v1231_v46, %v1235_v24 }
 0x25f   : > { %v1238_v7 = vadd.f32 %v1236_v60, %v1224_v56 }
 0x261   : > { %1239 = vst [vmem:[%s394_s19] sm:$0xff] %v1238_v7 }
 0x262   : > { %1779 = shalt.err (!%p1776_p5)
}
 0x263   : > { %1562 = dma.vmem_to_hbm [thread:$0]  (%p1908_p4), %s1257_s27, 128, %s1259_s29, %s1241_s24  }
 0x264 PF: > { %p1568_p6 = scmp.ge.s32.totalorder %s1830_s26, 2  ;;  %s1270_s13 = sand.u32 1, %s1810_s21  }
 0x265   : > { %s1271_s18 = scalar_lea.sflag [#allocation5], %s1270_s13 }
 0x266   : > { %p1565_p7 = pnand %p1568_p6, %p1915_p8 }
 0x268   : > { %p1566_p9 = pneg %p1565_p7 }
 0x26a   : > { %1805 = dma.done.wait (%p1566_p9), %s1271_s18, 128  }
 0x26b   : > { %1807 = vsyncadd (%p1566_p9), %s1271_s18, 4294967168  ;;  %s19_s26 = sadd.s32 1, %s1830_s26   ;;  %s2506_s21 = smov %s1814_s22 }
 0x26c   : > { %p16_p10 = scmp.ge.s32.totalorder %s19_s26, 4   ;;  %s2507_s22 = smov %s1818_s23 }
 0x26d   : > { %s2508_s23 = smov %s1921_s9  ;;  %s2509_s24 = smov %s1826_s25 }
 0x26e   : > { %s2510_s25 = smov %s2512_s28  ;;  %18 = sbr.rel (!%p16_p10) target bundleno = 4 (0x4), region = 102 }
 0x273   :  { %1277 = vsyncpa [#allocation5], 1 }
 0x274   :  { %1279 = vsyncpa [#allocation5 + $0x1], 1 }

</bundles_post_ra>
